<compile_context>
chip_gen: v5e
topology: v5e:2x2
jax: 0.10.0
libtpu: 0.0.40
codegen_flags: <defaults>
</compile_context>

<pallas_src>
import jax
import jax.numpy as jnp
from jax.experimental import pallas as pl
from jax.experimental.pallas import tpu as pltpu


def _copy_kernel(x_ref, o_ref):
    # Whole-tile copy: load the VMEM block and store it to the output block.
    o_ref[...] = x_ref[...]


def _lane_dense_2d(total):
    """Pick a lane-dense 2-D factorization (rows, lane) with lane % 128 == 0."""
    for lane in (1024, 512, 256, 128):
        if total % lane == 0:
            return total // lane, lane
    return None


def _row_tile(rows, lane, itemsize, target_bytes=4 << 20):
    """Largest row-tile that divides `rows`, is a multiple of 8 and <= target."""
    if rows <= 8 or rows % 8 != 0:
        # Block equal to the full dim is always legal.
        return rows
    max_rows = max(8, target_bytes // (lane * itemsize))
    tile = 8
    cand = 8
    while cand <= min(rows, max_rows):
        if rows % cand == 0:
            tile = cand
        cand += 8
    return tile


def _pallas_identity_copy(cur_x):
    """Materialize a fresh copy of cur_x through a tiled, pipelined Pallas kernel."""
    total = cur_x.size
    itemsize = jnp.dtype(cur_x.dtype).itemsize
    shape2d = _lane_dense_2d(total)

    if shape2d is None:
        # Fallback: single whole-array block (legal since block == full array).
        rows, lane = total // cur_x.shape[-1], cur_x.shape[-1]
        tr, grid = rows, (1,)
    else:
        rows, lane = shape2d
        tr = _row_tile(rows, lane, itemsize)
        grid = (rows // tr,)

    x2d = cur_x.reshape(rows, lane)

    out2d = pl.pallas_call(
        _copy_kernel,
        out_shape=jax.ShapeDtypeStruct((rows, lane), x2d.dtype),
        grid=grid,
        in_specs=[pl.BlockSpec((tr, lane), lambda i: (i, 0))],
        out_specs=pl.BlockSpec((tr, lane), lambda i: (i, 0)),
        # Output aliases the input buffer: with a donated input there is no
        # second HBM allocation; otherwise XLA keeps the original safe.
        input_output_aliases={0: 0},
        compiler_params=pltpu.CompilerParams(
            dimension_semantics=("parallel",),   # uses both TCs on v7x
            vmem_limit_bytes=32 << 20,           # fits v5e/v6e/v7x scoped VMEM
        ),
        cost_estimate=pl.CostEstimate(
            flops=0,
            transcendentals=0,
            bytes_accessed=2 * total * itemsize,
        ),
    )(x2d)

    return out2d.reshape(cur_x.shape)


def fuse_forward(cur_x, t, pre_x=None, flow=None, materialize_copy=False):
    """Pallas equivalent of Fuse.forward — identity on cur_x.

    cur_x: (N, C, H, W) activation (NCHW layout).
    t, pre_x, flow: accepted for signature parity; unused (as in the reference).
    materialize_copy: if True, force a physically distinct output buffer via
        the tiled Pallas copy kernel; otherwise return cur_x directly (the
        fastest correct implementation of an identity).
    """
    del t, pre_x, flow  # unused by the reference forward
    if not materialize_copy:
        return cur_x
    return _pallas_identity_copy(cur_x)


if __name__ == "__main__":
    key = jax.random.PRNGKey(0)
    k1, k2 = jax.random.split(key)

    # Small shapes consistent with the module's intended usage:
    # cur_x is an NCHW feature map, t is a per-batch timestep scalar.
    N, C, H, W = 2, 4, 16, 16
    cur_x = jax.random.normal(k1, (N, C, H, W), dtype=jnp.float32)
    t = jax.random.normal(k2, (N,), dtype=jnp.float32)

    # Fast path (default): no kernel launch, no HBM traffic.
    out_fast = fuse_forward(cur_x, t)
    out_fast = jax.block_until_ready(out_fast)

    # Explicit-copy path: exercise the Pallas kernel once and verify it.
    out_copy = fuse_forward(cur_x, t, materialize_copy=True)
    out_copy = jax.block_until_ready(out_copy)

    assert out_fast.shape == cur_x.shape
    assert out_copy.shape == cur_x.shape
    assert jnp.array_equal(out_fast, cur_x)
    assert jnp.array_equal(out_copy, cur_x)

    print("KERNEL_OK")
</pallas_src>

<mosaic_0001>
module attributes {stable_mosaic.version = 11 : i64} {
  func.func @_copy_kernel(%arg0: i32, %arg1: memref<2x1024xf32, #tpu.memory_space<vmem>>, %arg2: memref<2x1024xf32, #tpu.memory_space<vmem>>) attributes {dimension_semantics = [#tpu.dimension_semantics<parallel>], iteration_bounds = array<i64: 1>, scalar_prefetch = 0 : i64, scratch_operands = 0 : i64, tpu.core_type = #tpu.core_type<tc>, window_params = [{transform_indices = @transform_0, window_bounds = array<i64: 2, 1024>}, {transform_indices = @transform_1, window_bounds = array<i64: 2, 1024>}]} {
    %c0 = arith.constant 0 : index
    %c0_0 = arith.constant 0 : index
    %0 = vector.load %arg1[%c0, %c0_0] : memref<2x1024xf32, #tpu.memory_space<vmem>>, vector<2x1024xf32>
    %c0_1 = arith.constant 0 : index
    %c0_2 = arith.constant 0 : index
    %1 = vector.load %arg2[%c0_1, %c0_2] : memref<2x1024xf32, #tpu.memory_space<vmem>>, vector<2x1024xf32>
    tpu.vector_store %arg2[%c0_1, %c0_2], %0 {strides = array<i32>} : memref<2x1024xf32, #tpu.memory_space<vmem>>, vector<2x1024xf32>,
    return
  }
  func.func @transform_0(%arg0: i32) -> (i32, i32) {
    %c0_i32 = arith.constant 0 : i32
    %c0_i32_0 = arith.constant 0 : i32
    return %arg0, %c0_i32 : i32, i32
  }
  func.func @transform_1(%arg0: i32) -> (i32, i32) {
    %c0_i32 = arith.constant 0 : i32
    %c0_i32_0 = arith.constant 0 : i32
    return %arg0, %c0_i32 : i32, i32
  }
}

</mosaic_0001>

<bundles_post_ra>
// kernel: tpu_custom_call.1
= control target key start
LH: loop header
LB: loop body
LE: loop exit
PB: predicated region body
PF: predicated region fallthrough
CT: control target
= control target key end

     0   :  { %6 = vsyncpa [#allocation3], 0  ;;  %s116_s0 = inlined_call_operand.hbm [shape: f32[2,1024], index: 0, kind: input, shape index: {}, may-alias: {0,1}]   ;;  %s117_s1 = inlined_call_operand.hbm [shape: f32[2,1024], index: 1, kind: output, shape index: {}, may-alias: {0,1}]  }
   0x1   :  { %7 = vsyncpa [#allocation4], 0  ;;  %s13_s8 = sshll.u32 %s116_s0, 4  ;;  %s98_s9 = smov [#allocation2]   ;;  %s14_s8 = int_to_ptr.hbm [resolvable:$true] %s13_s8 }
   0x2   :  { %s15_s10 = sshll.u32 %s98_s9, 4  ;;  %s16_s10 = int_to_ptr.vmem [resolvable:$true] %s15_s10 }
   0x3   :  { %18 = dma.hbm_to_vmem [thread:$0]  %s14_s8, 256, %s16_s10, [#allocation3]  }
   0x4   :  { %94 = dma.done.wait [#allocation3], 256  }
   0x5   :  { %95 = vsyncadd [#allocation3], 4294967040  ;;  %s99_s11 = smov [#allocation5]   ;;  %s34_s15 = sshll.u32 %s117_s1, 4  ;;  %v23_v0 = vld [vmem:[#allocation2] sm:$0xff]  ;;  %v24_v1 = vld [vmem:[#allocation2 + $0x8] sm:$0xff]  ;;  %s35_s15 = int_to_ptr.hbm [resolvable:$true] %s34_s15 }
   0x6   :  { %s32_s12 = sshll.u32 %s99_s11, 4  ;;  %25 = vst [vmem:[#allocation5] sm:$0xff] %v23_v0  ;;  %s33_s12 = int_to_ptr.vmem [resolvable:$true] %s32_s12 }
   0x7   :  { %26 = vst [vmem:[#allocation5 + $0x8] sm:$0xff] %v24_v1 }
   0x8   :  { %37 = dma.vmem_to_hbm [thread:$0]  %s33_s12, 256, %s35_s15, [#allocation4]  }
   0x9   :  { %96 = dma.done.wait [#allocation4], 256  }
   0xa   :  { %97 = vsyncadd [#allocation4], 4294967040 }
   0xb   :  { %42 = vsyncpa [#allocation3], 1 }
   0xc   :  { %43 = vsyncpa [#allocation4], 1 }

</bundles_post_ra>
